<compile_context>
chip_gen: v5e
topology: v5e:2x2
jax: 0.10.0
libtpu: 0.0.40
codegen_flags: <defaults>
</compile_context>

<pallas_src>
import functools

import numpy as np
import jax
import jax.numpy as jnp
from jax.experimental import pallas as pl
from jax.experimental.pallas import tpu as pltpu


# ----------------------------- tiling helpers ------------------------------

_MAX_TILE_ELEMS = 256 * 1024  # 1 MiB f32 per operand tile -> ~10 MiB double-buffered


def _choose_rc(n):
    """Split flattened size n into (rows, cols): cols a multiple of 128 and rows a
    multiple of 8 when possible, so each tile maps to dense (8,128) vregs.
    Pure reshape -- no data movement."""
    for cols in (1024, 512, 2048, 256, 128):
        if n % cols == 0 and (n // cols) % 8 == 0:
            return n // cols, cols
    for cols in (1024, 512, 2048, 256, 128):
        if n % cols == 0:
            return n // cols, cols
    return 1, n  # fallback: single row, full width (block == full dims, still legal)


def _choose_row_tile(rows, cap):
    """Largest divisor of `rows` <= cap, preferring multiples of 8 (dense sublanes)."""
    if rows <= cap:
        return rows
    best8, best = 0, 1
    d = 1
    while d * d <= rows:
        if rows % d == 0:
            for cand in (d, rows // d):
                if cand <= cap:
                    if cand % 8 == 0:
                        best8 = max(best8, cand)
                    best = max(best, cand)
        d += 1
    return best8 if best8 else best


# --------------------------------- kernel ----------------------------------

def _wmis_kernel(li_ref, ui_ref,                       # scalar prefetch (SMEM int32[P])
                 lo_ref, up_ref, mid_ref,              # y_pred tiles [1,1,Rt,C]
                 yt_ref, mk_ref,                       # y_true / mask tiles [1,Rt,C]
                 d_sum_ref, r_sum_ref, mae_ref, msk_ref):  # SMEM outputs
    del li_ref, ui_ref  # only used inside the index_maps
    b = pl.program_id(0)
    rt = pl.program_id(1)
    p = pl.program_id(2)
    first_tile = jnp.logical_and(b == 0, rt == 0)

    lo = lo_ref[0, 0]          # (Rt, C)
    up = up_ref[0, 0]          # (Rt, C)
    yt = yt_ref[0]             # (Rt, C)

    # Per-pair partial sums (batch-factorized MIS loss).
    d_part = jnp.sum(up - lo)
    r_part = jnp.sum(jnp.maximum(lo - yt, 0.0) + jnp.maximum(yt - up, 0.0))

    @pl.when(first_tile)
    def _():
        d_sum_ref[p] = jnp.float32(0.0)
        r_sum_ref[p] = jnp.float32(0.0)

    d_sum_ref[p] += d_part
    r_sum_ref[p] += r_part

    # MAE against the middle quantile and mask sum: once per (b, rt) tile.
    @pl.when(p == 0)
    def _():
        mae_part = jnp.sum(jnp.abs(mid_ref[0, 0] - yt))
        msk_part = jnp.sum(mk_ref[0])

        @pl.when(first_tile)
        def _():
            mae_ref[0] = jnp.float32(0.0)
            msk_ref[0] = jnp.float32(0.0)

        mae_ref[0] += mae_part
        msk_ref[0] += msk_part


# -------------------------------- wrapper -----------------------------------

def weighted_mis_loss(y_pred, y_true, mask, quantiles, quantile_weights):
    """Pallas implementation of WeightedMISLoss.forward.

    y_pred:    [B, Q, T, H, W] float32
    y_true:    [B, T, H, W]    float32
    mask:      [B, T, H, W]    float32
    quantiles: [B, Q]          float32
    Returns (total_loss, individual_losses) with individual_losses stacked
    into a length-(Q//2 + 1) array (weighted pair losses ..., mae).
    """
    B, Q, T, H, W = y_pred.shape
    assert Q == len(quantile_weights)
    assert Q >= 2, "need at least one (lower, upper) quantile pair"
    P = Q // 2                    # middle_index / number of (lower, upper) pairs
    MIDQ = P
    N = T * H * W

    # Free reshapes only (contiguous), no transpose.
    R, C = _choose_rc(N)
    Rt = _choose_row_tile(R, max(1, _MAX_TILE_ELEMS // C))
    NRT = R // Rt

    yp = y_pred.reshape(B, Q, R, C).astype(jnp.float32)
    yt = y_true.reshape(B, R, C).astype(jnp.float32)
    mk = mask.reshape(B, R, C).astype(jnp.float32)

    li_np = np.arange(P)
    ui_np = (Q - 1) - li_np
    li = jnp.asarray(li_np, jnp.int32)
    ui = jnp.asarray(ui_np, jnp.int32)

    grid_spec = pltpu.PrefetchScalarGridSpec(
        num_scalar_prefetch=2,
        grid=(B, NRT, P),   # pair index innermost: yt/mask/mid tiles stay resident
        in_specs=[
            pl.BlockSpec((1, 1, Rt, C), lambda b, rt, p, li, ui: (b, li[p], rt, 0)),
            pl.BlockSpec((1, 1, Rt, C), lambda b, rt, p, li, ui: (b, ui[p], rt, 0)),
            pl.BlockSpec((1, 1, Rt, C), lambda b, rt, p, li, ui, m=MIDQ: (b, m, rt, 0)),
            pl.BlockSpec((1, Rt, C), lambda b, rt, p, li, ui: (b, rt, 0)),
            pl.BlockSpec((1, Rt, C), lambda b, rt, p, li, ui: (b, rt, 0)),
        ],
        out_specs=[
            pl.BlockSpec(memory_space=pltpu.MemorySpace.SMEM),  # pair d-sums [P]
            pl.BlockSpec(memory_space=pltpu.MemorySpace.SMEM),  # pair relu-sums [P]
            pl.BlockSpec(memory_space=pltpu.MemorySpace.SMEM),  # mae sum   [1]
            pl.BlockSpec(memory_space=pltpu.MemorySpace.SMEM),  # mask sum  [1]
        ],
    )

    d_sums, r_sums, mae_sum, mask_sum = pl.pallas_call(
        _wmis_kernel,
        out_shape=(
            jax.ShapeDtypeStruct((P,), jnp.float32),
            jax.ShapeDtypeStruct((P,), jnp.float32),
            jax.ShapeDtypeStruct((1,), jnp.float32),
            jax.ShapeDtypeStruct((1,), jnp.float32),
        ),
        grid_spec=grid_spec,
        compiler_params=pltpu.CompilerParams(
            dimension_semantics=("arbitrary", "arbitrary", "arbitrary"),
            vmem_limit_bytes=32 * 1024 * 1024,
        ),
    )(li, ui, yp, yp, yp, yt, mk)

    # Glue: combine partial sums into the PyTorch semantics.
    # alpha_{b,p} = 1 - (q[b, upper] - q[b, lower]);  csum[p] = sum_b 2/alpha  (>0 for quantiles in (0,1)).
    alpha = 1.0 - (quantiles[:, ui_np] - quantiles[:, li_np])          # [B, P]
    csum = jnp.sum(2.0 / alpha.astype(jnp.float32), axis=0)            # [P]

    # mean over the implicit outer [B_alpha, B_data, T, H, W] tensor:
    pair_means = (jnp.float32(B) * d_sums + csum * r_sums) / jnp.float32(B * B * N)
    mask_mean = mask_sum[0] / jnp.float32(B * N)      # mean(scalar*mask) = scalar*mean(mask)
    mae = mae_sum[0] / jnp.float32(B * N)

    qw = jnp.asarray(quantile_weights, jnp.float32)
    weights = (qw[li_np] + qw[ui_np]) * 0.5                            # [P]
    weighted = weights * pair_means * mask_mean

    total = jnp.sum(weighted) + mae
    individual = jnp.concatenate([weighted, mae[None]])
    return total, individual


# ------------------------------- reference ----------------------------------

def _reference(y_pred, y_true, mask, quantiles, quantile_weights):
    """Pure-JAX transcription of the PyTorch forward (for verification)."""
    B, Q = y_pred.shape[:2]
    mid = Q // 2
    total = jnp.float32(0.0)
    indiv = []
    for i in range(mid):
        lo, hi = i, Q - 1 - i
        lower = y_pred[:, lo]
        upper = y_pred[:, hi]
        alpha = (1.0 - (quantiles[:, hi] - quantiles[:, lo])).reshape(-1, 1, 1, 1, 1)
        loss = upper - lower
        loss = jnp.maximum(loss, loss + 2.0 / alpha * (lower - y_true))
        loss = jnp.maximum(loss, loss + 2.0 / alpha * (y_true - upper))
        loss = jnp.mean(loss)
        loss = jnp.mean(loss * mask)
        w = (quantile_weights[lo] + quantile_weights[hi]) / 2.0
        wl = w * loss
        indiv.append(wl)
        total = total + wl
    mae = jnp.mean(jnp.abs(y_pred[:, mid] - y_true))
    indiv.append(mae)
    total = total + mae
    return total, jnp.stack(indiv)


if __name__ == "__main__":
    B, Q, T, H, W = 2, 5, 4, 16, 16

    # Deterministic parameter init (module __init__ takes quantile_weights).
    quantile_weights = (0.2, 0.15, 0.3, 0.15, 0.2)

    key = jax.random.PRNGKey(0)
    k1, k2, k3, k4 = jax.random.split(key, 4)
    y_pred = jax.random.normal(k1, (B, Q, T, H, W), dtype=jnp.float32)
    y_true = jax.random.normal(k2, (B, T, H, W), dtype=jnp.float32)
    mask = (jax.random.uniform(k3, (B, T, H, W)) > 0.3).astype(jnp.float32)
    base_q = jnp.array([0.05, 0.25, 0.5, 0.75, 0.95], dtype=jnp.float32)
    quantiles = base_q[None, :] + 0.01 * jax.random.normal(k4, (B, Q), dtype=jnp.float32)

    total, individual = weighted_mis_loss(y_pred, y_true, mask, quantiles, quantile_weights)
    total = jax.block_until_ready(total)
    individual = jax.block_until_ready(individual)

    total_ref, individual_ref = _reference(y_pred, y_true, mask, quantiles, quantile_weights)
    np.testing.assert_allclose(np.asarray(total), np.asarray(total_ref), rtol=1e-4, atol=1e-4)
    np.testing.assert_allclose(np.asarray(individual), np.asarray(individual_ref),
                               rtol=1e-4, atol=1e-4)

    print("KERNEL_OK")
</pallas_src>

<mosaic_0001>
module attributes {stable_mosaic.version = 11 : i64} {
  func.func @_wmis_kernel(%arg0: i32, %arg1: i32, %arg2: i32, %arg3: memref<2xi32, #tpu.memory_space<smem>>, %arg4: memref<2xi32, #tpu.memory_space<smem>>, %arg5: memref<1x1x8x128xf32, #tpu.memory_space<vmem>>, %arg6: memref<1x1x8x128xf32, #tpu.memory_space<vmem>>, %arg7: memref<1x1x8x128xf32, #tpu.memory_space<vmem>>, %arg8: memref<1x8x128xf32, #tpu.memory_space<vmem>>, %arg9: memref<1x8x128xf32, #tpu.memory_space<vmem>>, %arg10: memref<2xf32, #tpu.memory_space<smem>>, %arg11: memref<2xf32, #tpu.memory_space<smem>>, %arg12: memref<1xf32, #tpu.memory_space<smem>>, %arg13: memref<1xf32, #tpu.memory_space<smem>>) attributes {dimension_semantics = [#tpu.dimension_semantics<arbitrary>, #tpu.dimension_semantics<arbitrary>, #tpu.dimension_semantics<arbitrary>], iteration_bounds = array<i64: 2, 1, 2>, scalar_prefetch = 2 : i64, scratch_operands = 0 : i64, tpu.core_type = #tpu.core_type<tc>, window_params = [{transform_indices = @transform_0, window_bounds = array<i64: 1, 1, 8, 128>}, {transform_indices = @transform_1, window_bounds = array<i64: 1, 1, 8, 128>}, {transform_indices = @transform_2, window_bounds = array<i64: 1, 1, 8, 128>}, {transform_indices = @transform_3, window_bounds = array<i64: 1, 8, 128>}, {transform_indices = @transform_4, window_bounds = array<i64: 1, 8, 128>}, {transform_indices = @transform_5, window_bounds = array<i64: 2>}, {transform_indices = @transform_6, window_bounds = array<i64: 2>}, {transform_indices = @transform_7, window_bounds = array<i64: 1>}, {transform_indices = @transform_8, window_bounds = array<i64: 1>}]} {
    %c0_i32 = arith.constant 0 : i32
    %0 = arith.cmpi eq, %arg0, %c0_i32 : i32
    %c0_i32_0 = arith.constant 0 : i32
    %1 = arith.cmpi eq, %arg1, %c0_i32_0 : i32
    %2 = arith.andi %0, %1 : i1
    %c0 = arith.constant 0 : index
    %c0_1 = arith.constant 0 : index
    %c0_2 = arith.constant 0 : index
    %c0_3 = arith.constant 0 : index
    %3 = vector.load %arg5[%c0, %c0_1, %c0_2, %c0_3] : memref<1x1x8x128xf32, #tpu.memory_space<vmem>>, vector<1x1x8x128xf32>
    %4 = vector.shape_cast %3 : vector<1x1x8x128xf32> to vector<8x128xf32>
    %c0_4 = arith.constant 0 : index
    %c0_5 = arith.constant 0 : index
    %c0_6 = arith.constant 0 : index
    %c0_7 = arith.constant 0 : index
    %5 = vector.load %arg6[%c0_4, %c0_5, %c0_6, %c0_7] : memref<1x1x8x128xf32, #tpu.memory_space<vmem>>, vector<1x1x8x128xf32>
    %6 = vector.shape_cast %5 : vector<1x1x8x128xf32> to vector<8x128xf32>
    %c0_8 = arith.constant 0 : index
    %c0_9 = arith.constant 0 : index
    %c0_10 = arith.constant 0 : index
    %7 = vector.load %arg8[%c0_8, %c0_9, %c0_10] : memref<1x8x128xf32, #tpu.memory_space<vmem>>, vector<1x8x128xf32>
    %8 = vector.shape_cast %7 : vector<1x8x128xf32> to vector<8x128xf32>
    %9 = arith.subf %6, %4 : vector<8x128xf32>
    %10 = vector.shape_cast %9 : vector<8x128xf32> to vector<1x8x128xf32>
    %cst = arith.constant dense<0.000000e+00> : vector<1xf32>
    %11 = vector.multi_reduction <add>, %10, %cst [1, 2] : vector<1x8x128xf32> to vector<1xf32>
    %12 = vector.shape_cast %11 : vector<1xf32> to vector<1x1x1xf32>
    %13 = vector.extract %12[0, 0, 0] : f32 from vector<1x1x1xf32>
    %14 = arith.subf %4, %8 : vector<8x128xf32>
    %cst_11 = arith.constant 0.000000e+00 : f32
    %15 = vector.broadcast %cst_11 : f32 to vector<8x128xf32>
    %16 = arith.maximumf %14, %15 : vector<8x128xf32>
    %17 = arith.subf %8, %6 : vector<8x128xf32>
    %cst_12 = arith.constant 0.000000e+00 : f32
    %18 = vector.broadcast %cst_12 : f32 to vector<8x128xf32>
    %19 = arith.maximumf %17, %18 : vector<8x128xf32>
    %20 = arith.addf %16, %19 : vector<8x128xf32>
    %21 = vector.shape_cast %20 : vector<8x128xf32> to vector<1x8x128xf32>
    %cst_13 = arith.constant dense<0.000000e+00> : vector<1xf32>
    %22 = vector.multi_reduction <add>, %21, %cst_13 [1, 2] : vector<1x8x128xf32> to vector<1xf32>
    %23 = vector.shape_cast %22 : vector<1xf32> to vector<1x1x1xf32>
    %24 = vector.extract %23[0, 0, 0] : f32 from vector<1x1x1xf32>
    %25 = arith.extui %2 : i1 to i32
    %c0_i32_14 = arith.constant 0 : i32
    %26 = arith.cmpi ne, %25, %c0_i32_14 : i32
    scf.if %26 {
      %cst_17 = arith.constant 0.000000e+00 : f32
      %40 = arith.index_cast %arg2 : i32 to index
      %41 = memref.load %arg10[%40] : memref<2xf32, #tpu.memory_space<smem>>
      memref.store %cst_17, %arg10[%40] : memref<2xf32, #tpu.memory_space<smem>>
      %cst_18 = arith.constant 0.000000e+00 : f32
      %42 = arith.index_cast %arg2 : i32 to index
      %43 = memref.load %arg11[%42] : memref<2xf32, #tpu.memory_space<smem>>
      memref.store %cst_18, %arg11[%42] : memref<2xf32, #tpu.memory_space<smem>>
    } else {
    }
    %27 = arith.index_cast %arg2 : i32 to index
    %28 = memref.load %arg10[%27] : memref<2xf32, #tpu.memory_space<smem>>
    %29 = arith.addf %28, %13 : f32
    %30 = arith.index_cast %arg2 : i32 to index
    %31 = memref.load %arg10[%30] : memref<2xf32, #tpu.memory_space<smem>>
    memref.store %29, %arg10[%30] : memref<2xf32, #tpu.memory_space<smem>>
    %32 = arith.index_cast %arg2 : i32 to index
    %33 = memref.load %arg11[%32] : memref<2xf32, #tpu.memory_space<smem>>
    %34 = arith.addf %33, %24 : f32
    %35 = arith.index_cast %arg2 : i32 to index
    %36 = memref.load %arg11[%35] : memref<2xf32, #tpu.memory_space<smem>>
    memref.store %34, %arg11[%35] : memref<2xf32, #tpu.memory_space<smem>>
    %c0_i32_15 = arith.constant 0 : i32
    %37 = arith.cmpi eq, %arg2, %c0_i32_15 : i32
    %38 = arith.extui %37 : i1 to i32
    %c0_i32_16 = arith.constant 0 : i32
    %39 = arith.cmpi ne, %38, %c0_i32_16 : i32
    scf.if %39 {
      %c0_17 = arith.constant 0 : index
      %c0_18 = arith.constant 0 : index
      %c0_19 = arith.constant 0 : index
      %c0_20 = arith.constant 0 : index
      %40 = vector.load %arg7[%c0_17, %c0_18, %c0_19, %c0_20] : memref<1x1x8x128xf32, #tpu.memory_space<vmem>>, vector<1x1x8x128xf32>
      %41 = vector.shape_cast %40 : vector<1x1x8x128xf32> to vector<8x128xf32>
      %42 = arith.subf %41, %8 : vector<8x128xf32>
      %43 = math.absf %42 : vector<8x128xf32>
      %44 = vector.shape_cast %43 : vector<8x128xf32> to vector<1x8x128xf32>
      %cst_21 = arith.constant dense<0.000000e+00> : vector<1xf32>
      %45 = vector.multi_reduction <add>, %44, %cst_21 [1, 2] : vector<1x8x128xf32> to vector<1xf32>
      %46 = vector.shape_cast %45 : vector<1xf32> to vector<1x1x1xf32>
      %47 = vector.extract %46[0, 0, 0] : f32 from vector<1x1x1xf32>
      %c0_22 = arith.constant 0 : index
      %c0_23 = arith.constant 0 : index
      %c0_24 = arith.constant 0 : index
      %48 = vector.load %arg9[%c0_22, %c0_23, %c0_24] : memref<1x8x128xf32, #tpu.memory_space<vmem>>, vector<1x8x128xf32>
      %49 = vector.shape_cast %48 : vector<1x8x128xf32> to vector<8x128xf32>
      %50 = vector.shape_cast %49 : vector<8x128xf32> to vector<1x8x128xf32>
      %cst_25 = arith.constant dense<0.000000e+00> : vector<1xf32>
      %51 = vector.multi_reduction <add>, %50, %cst_25 [1, 2] : vector<1x8x128xf32> to vector<1xf32>
      %52 = vector.shape_cast %51 : vector<1xf32> to vector<1x1x1xf32>
      %53 = vector.extract %52[0, 0, 0] : f32 from vector<1x1x1xf32>
      %54 = arith.extui %2 : i1 to i32
      %c0_i32_26 = arith.constant 0 : i32
      %55 = arith.cmpi ne, %54, %c0_i32_26 : i32
      scf.if %55 {
        %cst_31 = arith.constant 0.000000e+00 : f32
        %c0_32 = arith.constant 0 : index
        %62 = memref.load %arg12[%c0_32] : memref<1xf32, #tpu.memory_space<smem>>
        memref.store %cst_31, %arg12[%c0_32] : memref<1xf32, #tpu.memory_space<smem>>
        %cst_33 = arith.constant 0.000000e+00 : f32
        %c0_34 = arith.constant 0 : index
        %63 = memref.load %arg13[%c0_34] : memref<1xf32, #tpu.memory_space<smem>>
        memref.store %cst_33, %arg13[%c0_34] : memref<1xf32, #tpu.memory_space<smem>>
      } else {
      }
      %c0_27 = arith.constant 0 : index
      %56 = memref.load %arg12[%c0_27] : memref<1xf32, #tpu.memory_space<smem>>
      %57 = arith.addf %56, %47 : f32
      %c0_28 = arith.constant 0 : index
      %58 = memref.load %arg12[%c0_28] : memref<1xf32, #tpu.memory_space<smem>>
      memref.store %57, %arg12[%c0_28] : memref<1xf32, #tpu.memory_space<smem>>
      %c0_29 = arith.constant 0 : index
      %59 = memref.load %arg13[%c0_29] : memref<1xf32, #tpu.memory_space<smem>>
      %60 = arith.addf %59, %53 : f32
      %c0_30 = arith.constant 0 : index
      %61 = memref.load %arg13[%c0_30] : memref<1xf32, #tpu.memory_space<smem>>
      memref.store %60, %arg13[%c0_30] : memref<1xf32, #tpu.memory_space<smem>>
    } else {
    }
    return
  }
  func.func @transform_0(%arg0: i32, %arg1: i32, %arg2: i32, %arg3: memref<2xi32, #tpu.memory_space<smem>>, %arg4: memref<2xi32, #tpu.memory_space<smem>>) -> (i32, i32, i32, i32) {
    %0 = arith.index_cast %arg2 : i32 to index
    %1 = memref.load %arg3[%0] : memref<2xi32, #tpu.memory_space<smem>>
    %c0_i32 = arith.constant 0 : i32
    %c0_i32_0 = arith.constant 0 : i32
    return %arg0, %1, %arg1, %c0_i32 : i32, i32, i32, i32
  }
  func.func @transform_1(%arg0: i32, %arg1: i32, %arg2: i32, %arg3: memref<2xi32, #tpu.memory_space<smem>>, %arg4: memref<2xi32, #tpu.memory_space<smem>>) -> (i32, i32, i32, i32) {
    %0 = arith.index_cast %arg2 : i32 to index
    %1 = memref.load %arg4[%0] : memref<2xi32, #tpu.memory_space<smem>>
    %c0_i32 = arith.constant 0 : i32
    %c0_i32_0 = arith.constant 0 : i32
    return %arg0, %1, %arg1, %c0_i32 : i32, i32, i32, i32
  }
  func.func @transform_2(%arg0: i32, %arg1: i32, %arg2: i32, %arg3: memref<2xi32, #tpu.memory_space<smem>>, %arg4: memref<2xi32, #tpu.memory_space<smem>>) -> (i32, i32, i32, i32) {
    %c2_i32 = arith.constant 2 : i32
    %c0_i32 = arith.constant 0 : i32
    %c0_i32_0 = arith.constant 0 : i32
    return %arg0, %c2_i32, %arg1, %c0_i32 : i32, i32, i32, i32
  }
  func.func @transform_3(%arg0: i32, %arg1: i32, %arg2: i32, %arg3: memref<2xi32, #tpu.memory_space<smem>>, %arg4: memref<2xi32, #tpu.memory_space<smem>>) -> (i32, i32, i32) {
    %c0_i32 = arith.constant 0 : i32
    %c0_i32_0 = arith.constant 0 : i32
    return %arg0, %arg1, %c0_i32 : i32, i32, i32
  }
  func.func @transform_4(%arg0: i32, %arg1: i32, %arg2: i32, %arg3: memref<2xi32, #tpu.memory_space<smem>>, %arg4: memref<2xi32, #tpu.memory_space<smem>>) -> (i32, i32, i32) {
    %c0_i32 = arith.constant 0 : i32
    %c0_i32_0 = arith.constant 0 : i32
    return %arg0, %arg1, %c0_i32 : i32, i32, i32
  }
  func.func @transform_5(%arg0: i32, %arg1: i32, %arg2: i32, %arg3: memref<2xi32, #tpu.memory_space<smem>>, %arg4: memref<2xi32, #tpu.memory_space<smem>>) -> i32 {
    %c0_i32 = arith.constant 0 : i32
    %c0_i32_0 = arith.constant 0 : i32
    return %c0_i32 : i32
  }
  func.func @transform_6(%arg0: i32, %arg1: i32, %arg2: i32, %arg3: memref<2xi32, #tpu.memory_space<smem>>, %arg4: memref<2xi32, #tpu.memory_space<smem>>) -> i32 {
    %c0_i32 = arith.constant 0 : i32
    %c0_i32_0 = arith.constant 0 : i32
    return %c0_i32 : i32
  }
  func.func @transform_7(%arg0: i32, %arg1: i32, %arg2: i32, %arg3: memref<2xi32, #tpu.memory_space<smem>>, %arg4: memref<2xi32, #tpu.memory_space<smem>>) -> i32 {
    %c0_i32 = arith.constant 0 : i32
    %c0_i32_0 = arith.constant 0 : i32
    return %c0_i32 : i32
  }
  func.func @transform_8(%arg0: i32, %arg1: i32, %arg2: i32, %arg3: memref<2xi32, #tpu.memory_space<smem>>, %arg4: memref<2xi32, #tpu.memory_space<smem>>) -> i32 {
    %c0_i32 = arith.constant 0 : i32
    %c0_i32_0 = arith.constant 0 : i32
    return %c0_i32 : i32
  }
}

</mosaic_0001>

<bundles_post_ra>
// kernel: tpu_custom_call.1
= control target key start
LH: loop header
LB: loop body
LE: loop exit
PB: predicated region body
PF: predicated region fallthrough
CT: control target
= control target key end

     0   :  { %s1443_s19 = smov [#allocation3]   ;;  %s1444_s20 = smov [#allocation4]   ;;  %s1911_s0 = inlined_call_operand.hbm [shape: s32[2], index: 0, kind: input, shape index: {}]   ;;  %s1912_s2 = inlined_call_operand.hbm [shape: f32[2,5,8,128], index: 2, kind: input, shape index: {}]   ;;  %s1913_s3 = inlined_call_operand.hbm [shape: f32[2,5,8,128], index: 3, kind: input, shape index: {}]   ;;  %s1914_s4 = inlined_call_operand.hbm [shape: f32[2,5,8,128], index: 4, kind: input, shape index: {}]   ;;  %s1915_s5 = inlined_call_operand.hbm [shape: f32[2,8,128], index: 5, kind: input, shape index: {}]   ;;  %s1916_s6 = inlined_call_operand.hbm [shape: f32[2,8,128], index: 6, kind: input, shape index: {}]   ;;  %s1917_s7 = inlined_call_operand.hbm [shape: f32[2], index: 7, kind: output, shape index: {0}]   ;;  %s1918_s8 = inlined_call_operand.hbm [shape: f32[2], index: 8, kind: output, shape index: {1}]   ;;  %s1919_s9 = inlined_call_operand.hbm [shape: f32[1], index: 9, kind: output, shape index: {2}]   ;;  %s1920_s10 = inlined_call_operand.hbm [shape: f32[1], index: 10, kind: output, shape index: {3}]   ;;  %s1921_s1 = inlined_call_operand.hbm [shape: s32[2], index: 1, kind: input, shape index: {}]  }
   0x1   :  { %1943 = sst [smem:[#allocation48_spill]] %s1913_s3  ;;  %s17_s15 = sshll.u32 %s1911_s0, 4  ;;  %s18_s15 = int_to_ptr.hbm [resolvable:$true] %s17_s15 }
   0x2   :  { %1944 = sst [smem:[#allocation49_spill]] %s1915_s5  ;;  %s22_s18 = sshll.u32 %s1921_s1, 4  ;;  %s23_s18 = int_to_ptr.hbm [resolvable:$true] %s22_s18 }
   0x3   :  { %1945 = sst [smem:[#allocation50_spill]] %s1916_s6 }
   0x4   :  { %1946 = sst [smem:[#allocation51_spill]] %s1917_s7 }
   0x5   :  { %1947 = sst [smem:[#allocation52_spill]] %s1918_s8 }
   0x6   :  { %1948 = sst [smem:[#allocation53_spill]] %s1919_s9 }
   0x7   :  { %1949 = sst [smem:[#allocation54_spill]] %s1920_s10 }
   0x8   :  { %20 = dma.hbm_to_smem %s18_s15, 16, %s1443_s19, [#allocation2] }
   0x9   :  { %25 = dma.hbm_to_smem %s23_s18, 16, %s1444_s20, [#allocation2] }
   0xa   :  { %1357 = dma.done.wait [#allocation2], 32 }
   0xb   :  { %1358 = vsyncadd [#allocation2], 4294967264 }
   0xc   :  { %28 = sfence }
   0xd   :  { %29 = vsyncpa [#allocation6], 0 }
   0xe   :  { %31 = vsyncpa [#allocation6 + $0x1], 0 }
   0xf   :  { %32 = vsyncpa [#allocation9], 0 }
  0x10   :  { %34 = vsyncpa [#allocation9 + $0x1], 0 }
  0x11   :  { %35 = vsyncpa [#allocation12], 0 }
  0x12   :  { %37 = vsyncpa [#allocation12 + $0x1], 0 }
  0x13   :  { %38 = vsyncpa [#allocation7], 0 }
  0x14   :  { %39 = vsyncpa [#allocation16], 0 }
  0x15   :  { %40 = vsyncpa [#allocation19], 0  ;;  %s1512_s0 = smov 0   ;;  %s1514_s1 = smov 0  }
  0x16   :  { %s1516_s21 = smov 0   ;;  %s1518_s22 = smov 0  }
  0x17   :  { %s1520_s23 = smov 0   ;;  %s1522_s24 = smov 0  }
  0x18   :  { %s1524_s25 = smov 0   ;;  %s1526_s26 = smov 0  }
  0x19   :  { %s1528_s27 = smov 0   ;;  %s1530_s28 = smov 0  }
  0x1a   :  { %s1532_s29 = smov 0   ;;  %s1534_s30 = smov 0  }
  0x1b   :  { %s1536_s11 = smov 0   ;;  %s1538_s12 = smov 0  }
  0x1c LB: > { %1950 = sst [smem:[#allocation32_spill]] %s1393_s1  ;;  %s1581_s13 = sadd.s32 4294967295, %s1441_s12   ;;  %s1441_s12 = sphi %s1538_s12, %s46_s12   ;;  %s1437_s11 = sphi %s1536_s11, %s2018_s11   ;;  %s1433_s30 = sphi %s1534_s30, %s2010_s30   ;;  %s1429_s29 = sphi %s1532_s29, %s2017_s29   ;;  %s1425_s28 = sphi %s1530_s28, %s2009_s28   ;;  %s1421_s27 = sphi %s1528_s27, %s2016_s27   ;;  %s1417_s26 = sphi %s1526_s26, %s2015_s26   ;;  %s1413_s25 = sphi %s1524_s25, %s2014_s25   ;;  %s1409_s24 = sphi %s1522_s24, %s2013_s24   ;;  %s1405_s23 = sphi %s1520_s23, %s2006_s23   ;;  %s1401_s22 = sphi %s1518_s22, %s2005_s22   ;;  %s1397_s21 = sphi %s1516_s21, %s2004_s21   ;;  %s1393_s1 = sphi %s1514_s1, %s2003_s1   ;;  %s1389_s0 = sphi %s1512_s0, %s2002_s0  }
  0x1d   : > { %1951 = sst [smem:[#allocation33_spill]] %s1397_s21  ;;  %s58_s14 = sadd.s32 1, %s1433_s30 }
  0x1e   : > { %1952 = sst [smem:[#allocation34_spill]] %s1405_s23  ;;  %p59_p0 = scmp.ge.s32.totalorder %s58_s14, 2 }
  0x1f   : > { %1953 = sst [smem:[#allocation35_spill]] %s1409_s24  ;;  %s65_s15 = sadd.s32 1, %s1437_s11 }
  0x20   : > { %1954 = sst [smem:[#allocation36_spill]] %s1425_s28  ;;  %p1934_p1 = scmp.eq.s32.totalorder %s1441_s12, 0 }
  0x21   : > { %1955 = sst [smem:[#allocation37_spill]] %s1429_s29  ;;  %p1933_p2 = scmp.eq.s32.totalorder %s1581_s13, 0 }
  0x22   : > { %1956 = sst [smem:[#allocation38_spill]] %s1433_s30  ;;  %s2020_s14 = smov (%p59_p0, %s58_s14), 0 }
  0x23   : > { %1957 = sst [smem:[#allocation39_spill]] %s1441_s12  ;;  %s2022_s15 = smov (!%p59_p0, %s65_s15), %s1437_s11 }
  0x24   : > { %1958 = sst [smem:[#allocation40_spill]] %s2020_s14  ;;  %s110_s17 = sadd.s32 1, %s1409_s24 }
  0x25   : > { %s101_s16 = sld [smem:[#allocation4 + %s1433_s30]]  ;;  %p67_p3 = scmp.ge.s32.totalorder %s2022_s15, 2 }
  0x26   : > { %s102_s18 = sld [smem:[#allocation4 + %s2020_s14]]  ;;  %p117_p4 = scmp.ne.s32.totalorder %s1409_s24, %s1405_s23 }
  0x27   : > { %p123_p5 = scmp.ne.s32.totalorder %s1405_s23, %s1401_s22  ;;  %s2024_s15 = smov (%p67_p3, %s2022_s15), 0 }
  0x28   : > { %1959 = sst [smem:[#allocation41_spill]] %s2024_s15  ;;  %p1600_p6 = por %p117_p4, %p1934_p1 }
  0x29   : > { %p1606_p7 = por %p123_p5, %p1933_p2  ;;  %s1612_s22 = ssub.s32 %s1437_s11, %s2024_s15 }
  0x2a   : > { %p1935_p8 = scmp.lt.s32.totalorder %s1441_s12, 4  ;;  %s1930_s10 = smul.u32 5, %s1437_s11 }
  0x2b   : > { %s1961_s20 = scalar_select %p1606_p7, 1, 0 }
  0x2c   : > { %s104_s9 = ssub.s32 %s101_s16, %s102_s18  ;;  %s340_s28 = sand.u32 1, %s1409_s24  }
  0x2d   : > { %1962 = sst [smem:[#allocation42_spill]] %s1961_s20  ;;  %s105_s8 = sor.u32 %s104_s9, %s1612_s22 }
  0x2e   : > { %p108_p9 = scmp.eq.s32.totalorder %s105_s8, 0  ;;  %s851_s29 = sshll.u32 %s340_s28, 3 }
  0x2f   : > { %p1623_p10 = pnand %p1935_p8, %p1600_p6  ;;  %s342_s9 = scalar_lea.vmem [#allocation8], %s851_s29 }
  0x30   : > { %s1628_s15 = scalar_select %p108_p9, %s1409_s24, %s110_s17  }
  0x31   : > { %s891_s16 = scalar_select %p1600_p6, [#allocation4], [#allocation21] }
  0x32   : > { %1964 = sst [smem:[#allocation43_spill]] %s1628_s15  ;;  %s1639_s28 = sshll.u32 %s342_s9, 4 }
  0x33   : > { %s892_s8 = scalar_select %p1600_p6, %s1433_s30, 0 }
  0x34   : > { %s2026_s16 = smov (!%p1935_p8, %s891_s16), [#allocation23]  ;;  %1965 = sst [smem:[#allocation44_spill]] %s1639_s28 }
  0x35   : > { %s2028_s8 = smov (!%p1935_p8, %s892_s8), 0  ;;  %p859_p11 = scmp.ge.s32.totalorder %s1441_s12, 1 }
  0x36   : > { %s343_s17 = sld [smem:[%s2026_s16 + %s2028_s8]]  ;;  %p421_p12 = scmp.lt.s32.totalorder %s1441_s12, 5 }
  0x37   : > { %p136_p0 = scmp.eq.s32.totalorder %s1612_s22, 0  ;;  %s138_s19 = sadd.s32 1, %s1397_s21 }
  0x38   : > { %p1644_p13 = pnand %p859_p11, %p421_p12  ;;  %p145_p3 = scmp.ne.s32.totalorder %s1397_s21, %s1393_s1 }
  0x39   : > { %p151_p4 = scmp.ne.s32.totalorder %s1393_s1, %s1389_s0  ;;  %s1967_s3 = sld [smem:[#allocation48_spill]] }
  0x3a   : > { %p1661_p5 = por %p145_p3, %p1934_p1  ;;  %p1099_p11 = pneg %p1623_p10 }
  0x3b   : > { %p1667_p6 = por %p151_p4, %p1933_p2 }
  0x3c   : > { %s348_s7 = sadd.s32 %s1930_s10, %s343_s17  ;;  %s363_s17 = sand.u32 1, %s1397_s21  }
  0x3d   : > { %s852_s29 = sshll.u32 %s348_s7, 3  ;;  %s1971_s10 = sand.u32 1, %s1441_s12  }
  0x3e   : > { %s1969_s28 = scalar_select %p1667_p6, 1, 0 }
  0x3f   : > { %s350_s24 = scalar_lea.hbm %s1967_s3, %s852_s29  ;;  %s1674_s7 = scalar_lea.sflag [#allocation9], %s1971_s10 }
  0x40   : > { %s352_s8 = sshll.u32 %s350_s24, 4  ;;  %1970 = sst [smem:[#allocation45_spill]] %s1969_s28  ;;  %s353_s8 = int_to_ptr.hbm [resolvable:$true] %s352_s8 }
  0x41   : > { %s1095_s0 = sshra.s32 %s353_s8, 4  ;;  %s1102_s9 = scalar_lea.hbm %s1967_s3, 80  ;;  %s1096_s0 = int_to_ptr.hbm [resolvable:$true] %s1095_s0 }
  0x42   : > { %s1097_s15 = scalar_lea.hbm %s1096_s0, 8  ;;  %p1103_p4 = scmp.lt.s32.totalorder %s1096_s0, %s1967_s3 }
  0x43   : > { %p1098_p9 = scmp.ne.s32.totalorder %s1096_s0, %s1097_s15  ;;  %p1104_p2 = scmp.lt.s32.totalorder %s1102_s9, %s1097_s15 }
  0x45   : > { %p1100_p12 = pnand %p1099_p11, %p1098_p9  ;;  %p1105_p1 = por %p1104_p2, %p1103_p4 }
  0x47   : > { %p1101_p3 = pneg %p1100_p12 }
  0x49   : > { %p1106_p8 = pnand %p1105_p1, %p1101_p3 }
  0x4b   : > { %1109 = shalt.err (!%p1106_p8)
}
  0x4c   : > { %s1972_s10 = sld [smem:[#allocation44_spill]]  ;;  %s1694_s23 = sshll.u32 %s363_s17, 3 }
  0x4d   : > { %s1692_s1 = scalar_select %p136_p0, %s1397_s21, %s138_s19  }
  0x4e   : > { %p1975_p1 = scmp.lt.s32.totalorder %s1441_s12, 4  ;;  %s856_s0 = sshll.u32 %s1437_s11, 3 }
  0x4f   : > { %1974 = sst [smem:[#allocation46_spill]] %s1692_s1  ;;  %s387_s19 = scalar_lea.vmem [#allocation11], %s1694_s23 }
  0x50   : > { %p1700_p2 = pnand %p1975_p1, %p1661_p5  ;;  %s1977_s5 = sld [smem:[#allocation49_spill]] }
  0x51   : > { %s396_s17 = sshll.u32 %s387_s19, 4  ;;  %s1978_s29 = sand.u32 1, %s1441_s12   ;;  %s397_s17 = int_to_ptr.vmem [resolvable:$true] %s396_s17 }
  0x52   : > { %s1973_s28 = int_to_ptr.vmem [resolvable:$true] %s1972_s10  ;;  %s1711_s24 = scalar_lea.sflag [#allocation12], %s1978_s29 }
  0x53   : > { %932 = dma.hbm_to_vmem [thread:$0]  (!%p1623_p10), %s353_s8, 128, %s1973_s28, %s1674_s7  }
  0x54   : > { %s69_s9 = sld [smem:[#allocation3 + %s1433_s30]]  ;;  %p85_p8 = scmp.ne.s32.totalorder %s1421_s27, %s1417_s26 }
  0x55   : > { %s70_s10 = sld [smem:[#allocation3 + %s2020_s14]]  ;;  %p91_p10 = scmp.ne.s32.totalorder %s1417_s26, %s1413_s25 }
  0x56   : > { %s392_s8 = scalar_lea.hbm %s1977_s5, %s856_s0  ;;  %s1938_s15 = sand.u32 1, %s1421_s27  }
  0x57   : > { %s394_s16 = sshll.u32 %s392_s8, 4  ;;  %s1979_s6 = sld [smem:[#allocation50_spill]]  ;;  %s395_s16 = int_to_ptr.hbm [resolvable:$true] %s394_s16 }
  0x58   : > { %938 = dma.hbm_to_vmem [thread:$0]  (!%p1700_p2), %s395_s16, 128, %s397_s17, %s1711_s24  }
  0x59   : > { %p1980_p0 = scmp.eq.s32.totalorder %s1441_s12, 0  ;;  %s78_s29 = sadd.s32 1, %s1421_s27 }
  0x5a   : > { %p1981_p9 = scmp.eq.s32.totalorder %s1581_s13, 0  ;;  %s849_s16 = sshll.u32 %s1938_s15, 3 }
  0x5b   : > { %p87_p5 = por %p1980_p0, %p85_p8  ;;  %p1983_p12 = pmov %p1975_p1 }
  0x5c   : > { %p1733_p11 = por %p1981_p9, %p91_p10  ;;  %s72_s28 = ssub.s32 %s69_s9, %s70_s10 }
  0x5d   : > { %s1726_s19 = scalar_lea.hbm %s1979_s6, %s856_s0  ;;  %p1741_p3 = pnand %p1983_p12, %p87_p5 }
  0x5e   : > { %s888_s3 = scalar_select %p87_p5, [#allocation3], [#allocation20] }
  0x5f   : > { %s73_s0 = sor.u32 %s72_s28, %s1612_s22  ;;  %p1986_p8 = pmov %p1975_p1 }
  0x60   : > { %p76_p4 = scmp.eq.s32.totalorder %s73_s0, 0  ;;  %s2030_s3 = smov (!%p1975_p1, %s888_s3), [#allocation22] }
  0x61   : > { %s889_s8 = scalar_select %p87_p5, %s1433_s30, 0 }
  0x62   : > { %s1748_s5 = scalar_select %p76_p4, %s1421_s27, %s78_s29  }
  0x63   : > { %s2032_s8 = smov (!%p1986_p8, %s889_s8), 0  ;;  %s854_s15 = smul.u32 40, %s1437_s11 }
  0x64   : > { %1985 = sst [smem:[#allocation47_spill]] %s1748_s5  ;;  %s365_s14 = scalar_lea.vmem [#allocation10], %s1694_s23 }
  0x65   : > { %s320_s6 = sld [smem:[%s2030_s3 + %s2032_s8]]  ;;  %s376_s1 = sshll.u32 %s365_s14, 4  ;;  %s377_s1 = int_to_ptr.vmem [resolvable:$true] %s376_s1 }
  0x66   : > { %s319_s21 = scalar_lea.vmem [#allocation5], %s849_s16  ;;  %s709_s28 = scalar_lea.hbm %s1914_s4, %s854_s15 }
  0x67   : > { %s1756_s9 = sshll.u32 %s319_s21, 4  ;;  %s710_s29 = scalar_lea.hbm %s709_s28, 16  ;;  %s332_s9 = int_to_ptr.vmem [resolvable:$true] %s1756_s9 }
  0x68   : > { %s374_s0 = sshll.u32 %s710_s29, 4  ;;  %s414_s30 = sshll.u32 %s1726_s19, 4  ;;  %s375_s0 = int_to_ptr.hbm [resolvable:$true] %s374_s0  ;;  %s415_s30 = int_to_ptr.hbm [resolvable:$true] %s414_s30 }
  0x69   : > { %935 = dma.hbm_to_vmem [thread:$0]  (!%p1700_p2), %s375_s0, 128, %s377_s1, %s1674_s7  }
  0x6a   : > { %s1987_s5 = smul.u32 5, %s1437_s11  ;;  %s407_s14 = scalar_lea.vmem [#allocation13], %s1694_s23 }
  0x6b   : > { %s416_s16 = sshll.u32 %s407_s14, 4  ;;  %s1988_s10 = sand.u32 1, %s1421_s27   ;;  %s417_s16 = int_to_ptr.vmem [resolvable:$true] %s416_s16 }
  0x6c   : > { %s325_s3 = sadd.s32 %s1987_s5, %s320_s6  ;;  %s316_s28 = scalar_lea.sflag [#allocation6], %s1988_s10 }
  0x6d   : > { %s850_s21 = sshll.u32 %s325_s3, 3  ;;  %p1189_p0 = pneg %p1741_p3 }
  0x6e   : > { %s327_s22 = scalar_lea.hbm %s1912_s2, %s850_s21  ;;  %s1192_s1 = scalar_lea.hbm %s1912_s2, 80 }
  0x6f   : > { %s329_s15 = sshll.u32 %s327_s22, 4  ;;  %s330_s15 = int_to_ptr.hbm [resolvable:$true] %s329_s15 }
  0x70   : > { %s1185_s19 = sshra.s32 %s330_s15, 4  ;;  %s1186_s19 = int_to_ptr.hbm [resolvable:$true] %s1185_s19 }
  0x71   : > { %s1187_s7 = scalar_lea.hbm %s1186_s19, 8  ;;  %p1193_p12 = scmp.lt.s32.totalorder %s1186_s19, %s1912_s2 }
  0x72   : > { %p1188_p10 = scmp.ne.s32.totalorder %s1186_s19, %s1187_s7  ;;  %p1194_p4 = scmp.lt.s32.totalorder %s1192_s1, %s1187_s7 }
  0x74   : > { %p1190_p5 = pnand %p1189_p0, %p1188_p10  ;;  %p1195_p1 = por %p1194_p4, %p1193_p12 }
  0x76   : > { %p1191_p9 = pneg %p1190_p5 }
  0x78   : > { %p1196_p8 = pnand %p1195_p1, %p1191_p9 }
  0x7a   : > { %1199 = shalt.err (!%p1196_p8)
}
  0x7b   : > { %927 = dma.hbm_to_vmem [thread:$0]  (!%p1741_p3), %s330_s15, 128, %s332_s9, %s316_s28  }
  0x7c   : > { %941 = dma.hbm_to_vmem [thread:$0]  (!%p1700_p2), %s415_s30, 128, %s417_s16, %s1711_s24  }
  0x7d   : > { %425 = sbr.rel (%p1644_p13) target bundleno = 559 (0x22f), region = 40  ;;  %s427_s29 = sand.u32 (!%p1644_p13), 1, %s1417_s26  }
  0x7e   : > { %s860_s0 = sshll.u32 (!%p1644_p13), %s427_s29, 3  ;;  %s428_s3 = scalar_lea.sflag (!%p1644_p13), [#allocation6], %s427_s29 }
  0x7f   : > { %s431_s14 = scalar_lea.vmem (!%p1644_p13), [#allocation5], %s860_s0 }
  0x82   : > { %1360 = dma.done.wait (%p1733_p11), %s428_s3, 128  }
  0x83   : > { %1362 = vsyncadd (%p1733_p11), %s428_s3, 4294967168  ;;  %s1989_s25 = sld [smem:[#allocation34_spill]]  ;;  %s437_s9 = sand.u32 1, %s1581_s13  }
  0x84   : > { %s438_s24 = scalar_lea.sflag [#allocation9], %s437_s9 }
  0x89   : > { %s439_s20 = sand.u32 1, %s1989_s25  }
  0x8a   : > { %s861_s30 = sshll.u32 %s439_s20, 3 }
  0x8b   : > { %s441_s18 = scalar_lea.vmem [#allocation8], %s861_s30 }
  0x8c   : > { %1364 = dma.done.wait (%p1606_p7), %s438_s24, 128  }
  0x8d   : > { %1366 = vsyncadd (%p1606_p7), %s438_s24, 4294967168  ;;  %s1991_s16 = sld [smem:[#allocation32_spill]] }
  0x93   : > { %s449_s22 = sand.u32 1, %s1991_s16  }
  0x94   : > { %s1801_s15 = sshll.u32 %s449_s22, 3 }
  0x95   : > { %s451_s17 = scalar_lea.vmem [#allocation10], %s1801_s15 }
  0x96   : > { %1368 = dma.done.wait (%p1667_p6), %s438_s24, 128  }
  0x97   : > { %1370 = vsyncadd (%p1667_p6), %s438_s24, 4294967168  ;;  %s458_s10 = scalar_lea.sflag [#allocation12], %s437_s9  ;;  %s461_s28 = scalar_lea.vmem [#allocation11], %s1801_s15 }
  0x98   : > { %1372 = dma.done.wait (%p1667_p6), %s458_s10, 256  }
  0x99   : > { %1374 = vsyncadd (%p1667_p6), %s458_s10, 4294967040  ;;  %s1993_s19 = sld [smem:[#allocation37_spill]]  ;;  %v526_v0 = vld [vmem:[%s431_s14] sm:$0xff]  ;;  %v527_v1 = vld [vmem:[%s441_s18] sm:$0xff]  ;;  %s1445_s6 = smov 0.0  }
  0x9a   : > { %s1994_s7 = sld [smem:[#allocation36_spill]]  ;;  %v528_v2 = vld [vmem:[%s461_s28] sm:$0xff]  ;;  %v529_v3 = vsub.f32 %v527_v1, %v526_v0  ;;  %s471_s25 = scalar_lea.vmem [#allocation13], %s1801_s15 }
  0x9b   : > { %v539_v4 = vsub.f32 %v526_v0, %v528_v2  ;;  %v541_v5 = vsub.f32 %v528_v2, %v527_v1 }
  0x9c   : > { %530 = vadd.xlane.f32.xlu0 %v529_v3 }
  0x9d   : > { %v540_v6 = vmax.f32 %v539_v4, 0.0  ;;  %v542_v7 = vmax.f32 %v541_v5, 0.0 }
  0x9f   : > { %v543_v8 = vadd.f32 %v542_v7, %v540_v6  ;;  %p522_p7 = scmp.eq.s32.totalorder %s1993_s19, 0 }
  0xa0   : > { %s555_s5 = scalar_lea.smem [#allocation14], %s1994_s7  ;;  %s557_s1 = scalar_lea.smem [#allocation15], %s1994_s7 }
  0xa1   : > { %902 = sst [smem:[%s555_s5]] (%p522_p7), %s1445_s6  ;;  %p866_p13 = scmp.ne.s32.totalorder %s1994_s7, 0 }
  0xa2   : > { %903 = sst [smem:[%s557_s1]] (%p522_p7), %s1445_s6  ;;  %s1446_s9 = smov (!%p866_p13), 0.0  }
  0xa3   : > { %s559_s12 = sld [smem:[#allocation14 + %s1994_s7]] }
  0xa4   : > { %544 = vadd.xlane.f32.xlu0 %v543_v8  ;;  %s563_s29 = sld [smem:[#allocation15 + %s1994_s7]] }
 0x10f   : > { %v531_v9 = vpop.xlane.xlu0 %530 }
 0x110   : > { %v532_v10 = vrot.slane %v531_v9, 4 }
 0x112   : > { %v533_v11 = vadd.f32 %v532_v10, %v531_v9 }
 0x114   : > { %v534_v12 = vrot.slane %v533_v11, 2 }
 0x116   : > { %v535_v13 = vadd.f32 %v534_v12, %v533_v11 }
 0x117   : > { %v545_v14 = vpop.xlane.xlu0 %544 }
 0x118   : > { %v546_v15 = vrot.slane %v545_v14, 4  ;;  %v536_v16 = vrot.slane %v535_v13, 1 }
 0x11a   : > { %v547_v17 = vadd.f32 %v546_v15, %v545_v14  ;;  %v537_v18 = vadd.f32 %v536_v16, %v535_v13 }
 0x11c   : > { %v548_v19 = vrot.slane %v547_v17, 2  ;;  %880 = vpush %v537_v18 }
 0x11e   : > { %v549_v20 = vadd.f32 %v548_v19, %v547_v17 }
 0x120   : > { %v550_v21 = vrot.slane %v549_v20, 1 }
 0x122   : > { %v551_v22 = vadd.f32 %v550_v21, %v549_v20 }
 0x124   : > { %882 = vpush %v551_v22 }
 0x14d   : > { %s881_s23 = spop %880 }
 0x14e   : > { %s560_s0 = sadd.f32 %s881_s23, %s559_s12 }
 0x150   : > { %562 = sst [smem:[%s555_s5]] %s560_s0 }
 0x154   : > { %570 = sbr.rel (%p866_p13) target bundleno = 539 (0x21b), region = 68 }
 0x155   : > { %s883_s3 = spop %882 }
 0x156   : > { %s564_s14 = sadd.f32 %s883_s3, %s563_s29 }
 0x158   : > { %566 = sst [smem:[%s557_s1]] %s564_s14 }
 0x159   : > { %v571_v23 = vld [vmem:[%s451_s17] sm:$0xff]  ;;  %904 = sst [smem:[#allocation17]] (%p522_p7), %s1446_s9 }
 0x15a   : > { %v572_v24 = vsub.f32 %v571_v23, %v528_v2  ;;  %v583_v26 = vld [vmem:[%s471_s25] sm:$0xff]  ;;  %905 = sst [smem:[#allocation18]] (%p522_p7), %s1446_s9 }
 0x15b   : > { %s599_s20 = sld [smem:[#allocation17]] }
 0x15c   : > { %v573_v25 = vand.u32 2147483647, %v572_v24  ;;  %s603_s24 = sld [smem:[#allocation18]] }
 0x15e   : > { %574 = vadd.xlane.f32.xlu0 %v573_v25 }
 0x166   : > { %584 = vadd.xlane.f32.xlu0 %v583_v26 }
 0x1d1   : > { %v575_v27 = vpop.xlane.xlu0 %574 }
 0x1d2   : > { %v576_v28 = vrot.slane %v575_v27, 4 }
 0x1d4   : > { %v577_v29 = vadd.f32 %v576_v28, %v575_v27 }
 0x1d6   : > { %v578_v30 = vrot.slane %v577_v29, 2 }
 0x1d8   : > { %v579_v31 = vadd.f32 %v578_v30, %v577_v29 }
 0x1d9   : > { %v585_v32 = vpop.xlane.xlu0 %584 }
 0x1da   : > { %v586_v33 = vrot.slane %v585_v32, 4  ;;  %v580_v34 = vrot.slane %v579_v31, 1 }
 0x1dc   : > { %v587_v35 = vadd.f32 %v586_v33, %v585_v32  ;;  %v581_v36 = vadd.f32 %v580_v34, %v579_v31 }
 0x1de   : > { %v588_v37 = vrot.slane %v587_v35, 2  ;;  %884 = vpush %v581_v36 }
 0x1e0   : > { %v589_v38 = vadd.f32 %v588_v37, %v587_v35 }
 0x1e2   : > { %v590_v39 = vrot.slane %v589_v38, 1 }
 0x1e4   : > { %v591_v40 = vadd.f32 %v590_v39, %v589_v38 }
 0x1e6   : > { %886 = vpush %v591_v40 }
 0x20f   : > { %s885_s30 = spop %884 }
 0x210   : > { %s600_s18 = sadd.f32 %s885_s30, %s599_s20 }
 0x212   : > { %602 = sst [smem:[#allocation17]] %s600_s18 }
 0x217   : > { %s887_s16 = spop %886 }
 0x218   : > { %s604_s8 = sadd.f32 %s887_s16, %s603_s24 }
 0x21a   : > { %606 = sst [smem:[#allocation18]] %s604_s8 }
 0x21b PF: > { %p943_p6 = scmp.eq.s32.totalorder %s1581_s13, 3  ;;  %s1996_s17 = sld [smem:[#allocation52_spill]] }
 0x21c   : > { %s1447_s28 = smov [#allocation15]   ;;  %s1997_s5 = sld [smem:[#allocation51_spill]] }
 0x21d   : > { %s1448_s1 = smov [#allocation14]   ;;  %s1998_s29 = sld [smem:[#allocation53_spill]] }
 0x21e   : > { %s1999_s25 = sld [smem:[#allocation54_spill]]  ;;  %s1449_s9 = smov [#allocation17]  }
 0x21f   : > { %s1450_s20 = smov [#allocation18]  }
 0x221   : > { %s623_s10 = sshll.u32 %s1996_s17, 4  ;;  %s624_s10 = int_to_ptr.hbm [resolvable:$true] %s623_s10 }
 0x222   : > { %909 = dma.smem_to_hbm (%p943_p6), %s1447_s28, 16, %s624_s10, [#allocation16]  }
 0x223   : > { %s613_s6 = sshll.u32 %s1997_s5, 4  ;;  %s633_s0 = sshll.u32 %s1998_s29, 4  ;;  %s614_s6 = int_to_ptr.hbm [resolvable:$true] %s613_s6  ;;  %s634_s0 = int_to_ptr.hbm [resolvable:$true] %s633_s0 }
 0x224   : > { %907 = dma.smem_to_hbm (%p943_p6), %s1448_s1, 16, %s614_s6, [#allocation7]  }
 0x225   : > { %s643_s21 = sshll.u32 %s1999_s25, 4  ;;  %s644_s21 = int_to_ptr.hbm [resolvable:$true] %s643_s21 }
 0x226   : > { %911 = dma.smem_to_hbm (%p943_p6), %s1449_s9, 16, %s634_s0, [#allocation16]  }
 0x227   : > { %913 = dma.smem_to_hbm (%p943_p6), %s1450_s20, 16, %s644_s21, [#allocation19]  }
 0x228   : > { %1376 = dma.done.wait (%p943_p6), [#allocation7], 16  }
 0x229   : > { %1378 = vsyncadd (%p943_p6), [#allocation7], 4294967280 }
 0x22a   : > { %1380 = dma.done.wait (%p943_p6), [#allocation16], 32  }
 0x22b   : > { %1382 = vsyncadd (%p943_p6), [#allocation16], 4294967264 }
 0x22c   : > { %1384 = dma.done.wait (%p943_p6), [#allocation19], 16  }
 0x22d   : > { %1386 = vsyncadd (%p943_p6), [#allocation19], 4294967280 }
 0x22e   : > { %667 = sfence }
 0x22f PF: > { %s2000_s30 = sld [smem:[#allocation39_spill]]  ;;  %s2014_s25 = smov %s1417_s26 }
 0x230   : > { %s2002_s0 = sld [smem:[#allocation32_spill]]  ;;  %s2015_s26 = smov %s1421_s27 }
 0x231   : > { %s2003_s1 = sld [smem:[#allocation33_spill]]  ;;  %s2017_s29 = smov %s1437_s11 }
 0x232   : > { %s2004_s21 = sld [smem:[#allocation46_spill]] }
 0x233   : > { %s2005_s22 = sld [smem:[#allocation34_spill]] }
 0x234   : > { %s2006_s23 = sld [smem:[#allocation35_spill]] }
 0x235   : > { %s46_s12 = sadd.s32 1, %s2000_s30   ;;  %s2007_s18 = sld [smem:[#allocation43_spill]] }
 0x236   : > { %p1864_p2 = scmp.ge.s32.totalorder %s46_s12, 6   ;;  %s2008_s16 = sld [smem:[#allocation47_spill]] }
 0x237   : > { %s2009_s28 = sld [smem:[#allocation38_spill]] }
 0x238   : > { %s2010_s30 = sld [smem:[#allocation40_spill]] }
 0x239   : > { %s2011_s13 = sld [smem:[#allocation41_spill]] }
 0x23b   : > { %s2013_s24 = smov %s2007_s18  ;;  %45 = sbr.rel (!%p1864_p2) target bundleno = 28 (0x1c), region = 169 }
 0x23c   : > { %s2016_s27 = smov %s2008_s16 }
 0x23f   : > { %s2018_s11 = smov %s2011_s13 }
 0x240   :  { %673 = vsyncpa [#allocation6], 1 }
 0x241   :  { %675 = vsyncpa [#allocation6 + $0x1], 1 }
 0x242   :  { %676 = vsyncpa [#allocation9], 1 }
 0x243   :  { %678 = vsyncpa [#allocation9 + $0x1], 1 }
 0x244   :  { %679 = vsyncpa [#allocation12], 1 }
 0x245   :  { %681 = vsyncpa [#allocation12 + $0x1], 1 }
 0x246   :  { %682 = vsyncpa [#allocation7], 1 }
 0x247   :  { %684 = vsyncpa [#allocation7 + $0x1], 1 }
 0x248   :  { %685 = vsyncpa [#allocation16], 1 }
 0x249   :  { %686 = vsyncpa [#allocation19], 1 }

</bundles_post_ra>
